<compile_context>
chip_gen: v7x
topology: tpu7x:2x2x1
jax: 0.10.0
libtpu: 0.0.40
codegen_flags: <defaults>
</compile_context>

<pallas_src>
import jax
import jax.numpy as jnp
from jax.experimental import pallas as pl
from jax.experimental.pallas import tpu as pltpu


def _round_up(x: int, m: int) -> int:
    return (x + m - 1) // m * m


def _vmem_budget_bytes() -> int:
    try:
        return int(pltpu.get_tpu_info().vmem_capacity_bytes)
    except Exception:
        return 64 * 1024 * 1024        # conservative: v7x per-TensorCore VMEM


def _pick_tiles(N: int, Dp: int, budget: int):
    """Returns (T_row, T_col); guarantees T_row % T_col == 0 and both % 8 == 0."""
    if N <= 128:
        t = _round_up(N, 8)
        return t, t
    T_col = 256 if N >= 2048 else 128
    if N >= 8192 and budget >= 100 * 1024 * 1024:
        target = 1024          # v5e / v6e (128 MiB VMEM): tallest row panel
    elif N >= 2048:
        target = 512           # clears the v5e / v7x bf16 rooflines
    else:
        target = 256
    # keep >= 2 row blocks for megacore while bounding row-padding waste
    T_row = min(target, max(T_col, _round_up(N, 2 * T_col) // 2))

    def footprint(tr, tc):
        inputs = 2 * (tr + tc) * Dp * 2        # double-buffered bf16 panels
        scratch = 4 * tr * 4                   # l/pos accumulators + out block
        temps = 4 * tr * tc * 4                # sim / p / mask temporaries
        return inputs + scratch + temps

    while T_row > T_col and footprint(T_row, T_col) > 0.6 * budget:
        T_row = max(T_col, (T_row // 2) // T_col * T_col)
    # TODO(synk): for very large D (>= ~4-8K) add a feature-dim grid axis with a
    # (T_row, T_col) f32 sim accumulator instead of shrinking the row panel.
    return T_row, T_col


def _build_call(N: int, Dp: int, inv_temp: float):
    budget = _vmem_budget_bytes()
    T_row, T_col = _pick_tiles(N, Dp, budget)
    Np = _round_up(N, T_row)               # T_row % T_col == 0 -> also % T_col
    n_row_blocks = Np // T_row
    n_col_blocks = Np // T_col
    has_col_pad = Np != N
    first_pad_block = N // T_col           # first column block with pad columns

    def kernel(zr_ref, zc_ref, out_ref, l_acc, pos_acc):
        i = pl.program_id(0)               # row block    ("parallel")
        j = pl.program_id(1)               # column block ("arbitrary" reduction)

        @pl.when(j == 0)
        def _init():
            l_acc[...] = jnp.zeros_like(l_acc)
            pos_acc[...] = jnp.zeros_like(pos_acc)

        # MXU: bf16 x bf16 -> f32 accumulate, contraction over the feature dim.
        # zr was pre-scaled by 1/temperature, so `sim` is already cos / T.
        sim = jax.lax.dot_general(
            zr_ref[...], zc_ref[...],
            dimension_numbers=(((1,), (1,)), ((), ())),
            preferred_element_type=jnp.float32)            # (T_row, T_col)

        # cos <= 1  =>  sim <= 1/T : constant-shift online logsumexp.
        p = jnp.exp(sim - inv_temp)
        l_acc[...] += jnp.sum(p, axis=-1, keepdims=True)

        # Diagonal band: the only column tiles holding this row block's
        # self term (col == row) and positive (col == row ^ 1).
        in_diag_band = ((j * T_col < (i + 1) * T_row) &
                        ((j + 1) * T_col > i * T_row))

        @pl.when(in_diag_band)
        def _diag():
            row_g = (jax.lax.broadcasted_iota(jnp.int32, (T_row, T_col), 0)
                     + i * T_row)
            col_g = (jax.lax.broadcasted_iota(jnp.int32, (T_row, T_col), 1)
                     + j * T_col)
            l_acc[...] -= jnp.sum(jnp.where(col_g == row_g, p, 0.0),
                                  axis=-1, keepdims=True)
            pos_acc[...] += jnp.sum(jnp.where(col_g == (row_g ^ 1), sim, 0.0),
                                    axis=-1, keepdims=True)

        if has_col_pad:
            # Zero-padded columns (>= N) live only in trailing column blocks;
            # remove their exp contributions exactly.
            @pl.when(j >= first_pad_block)
            def _pad():
                col_g = (jax.lax.broadcasted_iota(jnp.int32, (T_row, T_col), 1)
                         + j * T_col)
                l_acc[...] -= jnp.sum(jnp.where(col_g >= N, p, 0.0),
                                      axis=-1, keepdims=True)

        @pl.when(j == n_col_blocks - 1)
        def _finalize():
            lse = jnp.log(jnp.maximum(l_acc[...], 1e-30)) + inv_temp
            out_ref[...] = lse - pos_acc[...]            # per-row loss

    grid_spec = pltpu.PrefetchScalarGridSpec(
        num_scalar_prefetch=0,
        grid=(n_row_blocks, n_col_blocks),
        in_specs=[
            pl.BlockSpec((T_row, Dp), lambda i, j: (i, 0)),   # tall row panel
            pl.BlockSpec((T_col, Dp), lambda i, j: (j, 0)),   # streamed columns
        ],
        out_specs=pl.BlockSpec((T_row, 1), lambda i, j: (i, 0)),
        scratch_shapes=[pltpu.VMEM((T_row, 1), jnp.float32),   # sum of exp
                        pltpu.VMEM((T_row, 1), jnp.float32)],  # positive logit
    )

    footprint = (2 * (T_row + T_col) * Dp * 2 + 4 * T_row * 4
                 + 4 * T_row * T_col * 4)
    vmem_limit = int(min(0.9 * budget,
                         max(32 * 1024 * 1024, footprint + (16 << 20))))

    call = pl.pallas_call(
        kernel,
        out_shape=jax.ShapeDtypeStruct((Np, 1), jnp.float32),
        grid_spec=grid_spec,
        compiler_params=pltpu.CompilerParams(
            dimension_semantics=("parallel", "arbitrary"),
            vmem_limit_bytes=vmem_limit),
    )
    return call, Np


def make_nt_xent(batch_size: int, temperature: float):
    """Returns a jitted (z_i, z_j) -> scalar NT-Xent loss.

    Covers both forward() and forward_diff() of the PyTorch module (same
    formula, any runtime batch size; shapes are static under jit).
    """
    del batch_size
    inv_temp = float(1.0 / temperature)
    eps2 = 1e-8 ** 2                     # torch.nn.CosineSimilarity eps, squared

    @jax.jit
    def fn(z_i, z_j):
        assert z_i.ndim == 2 and z_i.shape == z_j.shape
        B, D = z_i.shape
        N = 2 * B
        Dp = _round_up(max(D, 1), 128)
        call, Np = _build_call(N, Dp, inv_temp)

        # Interleave: rows (2k, 2k+1) = (z_i[k], z_j[k]) -> partner(r) = r ^ 1.
        z = jnp.stack([z_i.astype(jnp.float32), z_j.astype(jnp.float32)],
                      axis=1).reshape(N, D)
        # One-shot L2 normalization (hoisted out of the kernel).
        zn = z * jax.lax.rsqrt(
            jnp.maximum(jnp.sum(z * z, axis=-1, keepdims=True), eps2))
        # Temperature folded into the low-traffic row operand; bf16 for the MXU.
        zr = (zn * inv_temp).astype(jnp.bfloat16)
        zc = zn.astype(jnp.bfloat16)
        # Zero-pad lanes to a multiple of 128 and rows to the tile grid
        # (padding changes neither norms nor dot products).
        zr = jnp.pad(zr, ((0, Np - N), (0, Dp - D)))
        zc = jnp.pad(zc, ((0, Np - N), (0, Dp - D)))

        per_row = call(zr, zc)[:N, 0]            # padded rows sliced away
        return jnp.sum(per_row) / N

    return fn


def nt_xent_reference(z_i, z_j, temperature):
    """Pure-JAX f32 reference mirroring the PyTorch forward()."""
    B = z_i.shape[0]
    N = 2 * B
    z = jnp.concatenate([z_i, z_j], axis=0).astype(jnp.float32)
    zn = z / jnp.maximum(jnp.linalg.norm(z, axis=-1, keepdims=True), 1e-8)
    sim = (zn @ zn.T) / temperature
    row = jnp.arange(N)[:, None]
    col = jnp.arange(N)[None, :]
    pos_mask = (col == row + B) | (col == row - B)
    pos = jnp.sum(jnp.where(pos_mask, sim, 0.0), axis=-1)
    sim_nd = jnp.where(row == col, -jnp.inf, sim)
    lse = jax.scipy.special.logsumexp(sim_nd, axis=-1)
    return jnp.sum(lse - pos) / N


if __name__ == "__main__":
    temperature = 0.5
    key = jax.random.PRNGKey(0)
    k1, k2, k3, k4, k5, k6 = jax.random.split(key, 6)

    # Small shape implied by the module: batch=4, hidden=32 (single-tile path).
    z_i = jax.random.normal(k1, (4, 32), dtype=jnp.float32)
    z_j = jax.random.normal(k2, (4, 32), dtype=jnp.float32)
    loss = make_nt_xent(4, temperature)(z_i, z_j)
    jax.block_until_ready(loss)
    ref = nt_xent_reference(z_i, z_j, temperature)
    assert jnp.allclose(loss, ref, rtol=5e-2, atol=5e-2), (loss, ref)

    # Multi-block path: grid (2, 2) with row and column padding (N = 192).
    z_i2 = jax.random.normal(k3, (96, 48), dtype=jnp.float32)
    z_j2 = jax.random.normal(k4, (96, 48), dtype=jnp.float32)
    loss2 = make_nt_xent(96, temperature)(z_i2, z_j2)
    jax.block_until_ready(loss2)
    ref2 = nt_xent_reference(z_i2, z_j2, temperature)
    assert jnp.allclose(loss2, ref2, rtol=5e-2, atol=5e-2), (loss2, ref2)

    # Asymmetric-tile path: T_row=256, T_col=128, trailing padded column blocks.
    z_i3 = jax.random.normal(k5, (300, 64), dtype=jnp.float32)
    z_j3 = jax.random.normal(k6, (300, 64), dtype=jnp.float32)
    loss3 = make_nt_xent(300, temperature)(z_i3, z_j3)
    jax.block_until_ready(loss3)
    ref3 = nt_xent_reference(z_i3, z_j3, temperature)
    assert jnp.allclose(loss3, ref3, rtol=5e-2, atol=5e-2), (loss3, ref3)

    print("KERNEL_OK")
</pallas_src>

<mosaic_0001>
module attributes {stable_mosaic.version = 11 : i64} {
  func.func @kernel(%arg0: i32, %arg1: i32, %arg2: memref<8x128xbf16, #tpu.memory_space<vmem>>, %arg3: memref<8x128xbf16, #tpu.memory_space<vmem>>, %arg4: memref<8x1xf32, #tpu.memory_space<vmem>>, %arg5: memref<8x1xf32, #tpu.memory_space<vmem>>, %arg6: memref<8x1xf32, #tpu.memory_space<vmem>>) attributes {dimension_semantics = [#tpu.dimension_semantics<parallel>, #tpu.dimension_semantics<arbitrary>], iteration_bounds = array<i64: 1, 1>, scalar_prefetch = 0 : i64, scratch_operands = 2 : i64, tpu.core_type = #tpu.core_type<tc>, window_params = [{transform_indices = @transform_0, window_bounds = array<i64: 8, 128>}, {transform_indices = @transform_1, window_bounds = array<i64: 8, 128>}, {transform_indices = @transform_2, window_bounds = array<i64: 8, 1>}]} {
    %c0_i32 = arith.constant 0 : i32
    %0 = arith.cmpi eq, %arg1, %c0_i32 : i32
    %1 = arith.extui %0 : i1 to i32
    %c0_i32_0 = arith.constant 0 : i32
    %2 = arith.cmpi ne, %1, %c0_i32_0 : i32
    scf.if %2 {
      %cst_17 = arith.constant 0.000000e+00 : f32
      %28 = vector.broadcast %cst_17 : f32 to vector<8x1xf32>
      %c0_18 = arith.constant 0 : index
      %c0_19 = arith.constant 0 : index
      %29 = vector.load %arg5[%c0_18, %c0_19] : memref<8x1xf32, #tpu.memory_space<vmem>>, vector<8x1xf32>
      tpu.vector_store %arg5[%c0_18, %c0_19], %28 {strides = array<i32>} : memref<8x1xf32, #tpu.memory_space<vmem>>, vector<8x1xf32>,
      %cst_20 = arith.constant 0.000000e+00 : f32
      %30 = vector.broadcast %cst_20 : f32 to vector<8x1xf32>
      %c0_21 = arith.constant 0 : index
      %c0_22 = arith.constant 0 : index
      %31 = vector.load %arg6[%c0_21, %c0_22] : memref<8x1xf32, #tpu.memory_space<vmem>>, vector<8x1xf32>
      tpu.vector_store %arg6[%c0_21, %c0_22], %30 {strides = array<i32>} : memref<8x1xf32, #tpu.memory_space<vmem>>, vector<8x1xf32>,
    } else {
    }
    %c0 = arith.constant 0 : index
    %c0_1 = arith.constant 0 : index
    %3 = vector.load %arg2[%c0, %c0_1] : memref<8x128xbf16, #tpu.memory_space<vmem>>, vector<8x128xbf16>
    %c0_2 = arith.constant 0 : index
    %c0_3 = arith.constant 0 : index
    %4 = vector.load %arg3[%c0_2, %c0_3] : memref<8x128xbf16, #tpu.memory_space<vmem>>, vector<8x128xbf16>
    %cst = arith.constant dense<0.000000e+00> : vector<8x8xf32>
    %5 = tpu.matmul %3, %4, %cst {dimension_numbers = #tpu.dot_dimension_numbers<[1], [1], [0], [0], [0, 0, 1, 0], [], []>} : vector<8x128xbf16>, vector<8x128xbf16>, vector<8x8xf32> -> vector<8x8xf32>
    %cst_4 = arith.constant 2.000000e+00 : f32
    %6 = vector.broadcast %cst_4 : f32 to vector<8x8xf32>
    %7 = arith.subf %5, %6 : vector<8x8xf32>
    %8 = math.exp %7 : vector<8x8xf32>
    %c0_5 = arith.constant 0 : index
    %c0_6 = arith.constant 0 : index
    %9 = vector.load %arg5[%c0_5, %c0_6] : memref<8x1xf32, #tpu.memory_space<vmem>>, vector<8x1xf32>
    %cst_7 = arith.constant dense<0.000000e+00> : vector<8xf32>
    %10 = vector.multi_reduction <add>, %8, %cst_7 [1] : vector<8x8xf32> to vector<8xf32>
    %11 = vector.shape_cast %10 : vector<8xf32> to vector<8x1xf32>
    %12 = arith.addf %9, %11 : vector<8x1xf32>
    %c0_8 = arith.constant 0 : index
    %c0_9 = arith.constant 0 : index
    %13 = vector.load %arg5[%c0_8, %c0_9] : memref<8x1xf32, #tpu.memory_space<vmem>>, vector<8x1xf32>
    tpu.vector_store %arg5[%c0_8, %c0_9], %12 {strides = array<i32>} : memref<8x1xf32, #tpu.memory_space<vmem>>, vector<8x1xf32>,
    %c8_i32 = arith.constant 8 : i32
    %14 = arith.muli %arg1, %c8_i32 : i32
    %c1_i32 = arith.constant 1 : i32
    %15 = arith.addi %arg0, %c1_i32 : i32
    %c8_i32_10 = arith.constant 8 : i32
    %16 = arith.muli %15, %c8_i32_10 : i32
    %17 = arith.cmpi slt, %14, %16 : i32
    %c1_i32_11 = arith.constant 1 : i32
    %18 = arith.addi %arg1, %c1_i32_11 : i32
    %c8_i32_12 = arith.constant 8 : i32
    %19 = arith.muli %18, %c8_i32_12 : i32
    %c8_i32_13 = arith.constant 8 : i32
    %20 = arith.muli %arg0, %c8_i32_13 : i32
    %21 = arith.cmpi sgt, %19, %20 : i32
    %22 = arith.andi %17, %21 : i1
    %23 = arith.extui %22 : i1 to i32
    %c0_i32_14 = arith.constant 0 : i32
    %24 = arith.cmpi ne, %23, %c0_i32_14 : i32
    scf.if %24 {
      %28 = tpu.iota {dimensions = array<i32: 0>} : vector<8x8xi32>
      %c8_i32_17 = arith.constant 8 : i32
      %29 = arith.muli %arg0, %c8_i32_17 : i32
      %30 = vector.broadcast %29 : i32 to vector<8x8xi32>
      %31 = arith.addi %28, %30 : vector<8x8xi32>
      %32 = tpu.iota {dimensions = array<i32: 1>} : vector<8x8xi32>
      %c8_i32_18 = arith.constant 8 : i32
      %33 = arith.muli %arg1, %c8_i32_18 : i32
      %34 = vector.broadcast %33 : i32 to vector<8x8xi32>
      %35 = arith.addi %32, %34 : vector<8x8xi32>
      %c0_19 = arith.constant 0 : index
      %c0_20 = arith.constant 0 : index
      %36 = vector.load %arg5[%c0_19, %c0_20] : memref<8x1xf32, #tpu.memory_space<vmem>>, vector<8x1xf32>
      %37 = arith.cmpi eq, %35, %31 : vector<8x8xi32>
      %cst_21 = arith.constant 0.000000e+00 : f32
      %38 = vector.broadcast %cst_21 : f32 to vector<8x8xf32>
      %39 = arith.select %37, %8, %38 : vector<8x8xi1>, vector<8x8xf32>
      %cst_22 = arith.constant dense<0.000000e+00> : vector<8xf32>
      %40 = vector.multi_reduction <add>, %39, %cst_22 [1] : vector<8x8xf32> to vector<8xf32>
      %41 = vector.shape_cast %40 : vector<8xf32> to vector<8x1xf32>
      %42 = arith.subf %36, %41 : vector<8x1xf32>
      %c0_23 = arith.constant 0 : index
      %c0_24 = arith.constant 0 : index
      %43 = vector.load %arg5[%c0_23, %c0_24] : memref<8x1xf32, #tpu.memory_space<vmem>>, vector<8x1xf32>
      tpu.vector_store %arg5[%c0_23, %c0_24], %42 {strides = array<i32>} : memref<8x1xf32, #tpu.memory_space<vmem>>, vector<8x1xf32>,
      %c0_25 = arith.constant 0 : index
      %c0_26 = arith.constant 0 : index
      %44 = vector.load %arg6[%c0_25, %c0_26] : memref<8x1xf32, #tpu.memory_space<vmem>>, vector<8x1xf32>
      %c1_i32_27 = arith.constant 1 : i32
      %45 = vector.broadcast %c1_i32_27 : i32 to vector<8x8xi32>
      %46 = arith.xori %31, %45 : vector<8x8xi32>
      %47 = arith.cmpi eq, %35, %46 : vector<8x8xi32>
      %cst_28 = arith.constant 0.000000e+00 : f32
      %48 = vector.broadcast %cst_28 : f32 to vector<8x8xf32>
      %49 = arith.select %47, %5, %48 : vector<8x8xi1>, vector<8x8xf32>
      %cst_29 = arith.constant dense<0.000000e+00> : vector<8xf32>
      %50 = vector.multi_reduction <add>, %49, %cst_29 [1] : vector<8x8xf32> to vector<8xf32>
      %51 = vector.shape_cast %50 : vector<8xf32> to vector<8x1xf32>
      %52 = arith.addf %44, %51 : vector<8x1xf32>
      %c0_30 = arith.constant 0 : index
      %c0_31 = arith.constant 0 : index
      %53 = vector.load %arg6[%c0_30, %c0_31] : memref<8x1xf32, #tpu.memory_space<vmem>>, vector<8x1xf32>
      tpu.vector_store %arg6[%c0_30, %c0_31], %52 {strides = array<i32>} : memref<8x1xf32, #tpu.memory_space<vmem>>, vector<8x1xf32>,
    } else {
    }
    %c0_i32_15 = arith.constant 0 : i32
    %25 = arith.cmpi eq, %arg1, %c0_i32_15 : i32
    %26 = arith.extui %25 : i1 to i32
    %c0_i32_16 = arith.constant 0 : i32
    %27 = arith.cmpi ne, %26, %c0_i32_16 : i32
    scf.if %27 {
      %c0_17 = arith.constant 0 : index
      %c0_18 = arith.constant 0 : index
      %28 = vector.load %arg5[%c0_17, %c0_18] : memref<8x1xf32, #tpu.memory_space<vmem>>, vector<8x1xf32>
      %cst_19 = arith.constant 1.000000e-30 : f32
      %29 = vector.broadcast %cst_19 : f32 to vector<8x1xf32>
      %30 = arith.maximumf %28, %29 : vector<8x1xf32>
      %31 = math.log %30 : vector<8x1xf32>
      %cst_20 = arith.constant 2.000000e+00 : f32
      %32 = vector.broadcast %cst_20 : f32 to vector<8x1xf32>
      %33 = arith.addf %31, %32 : vector<8x1xf32>
      %c0_21 = arith.constant 0 : index
      %c0_22 = arith.constant 0 : index
      %34 = vector.load %arg6[%c0_21, %c0_22] : memref<8x1xf32, #tpu.memory_space<vmem>>, vector<8x1xf32>
      %35 = arith.subf %33, %34 : vector<8x1xf32>
      %c0_23 = arith.constant 0 : index
      %c0_24 = arith.constant 0 : index
      %36 = vector.load %arg4[%c0_23, %c0_24] : memref<8x1xf32, #tpu.memory_space<vmem>>, vector<8x1xf32>
      tpu.vector_store %arg4[%c0_23, %c0_24], %35 {strides = array<i32>} : memref<8x1xf32, #tpu.memory_space<vmem>>, vector<8x1xf32>,
    } else {
    }
    return
  }
  func.func @transform_0(%arg0: i32, %arg1: i32) -> (i32, i32) {
    %c0_i32 = arith.constant 0 : i32
    %c0_i32_0 = arith.constant 0 : i32
    return %arg0, %c0_i32 : i32, i32
  }
  func.func @transform_1(%arg0: i32, %arg1: i32) -> (i32, i32) {
    %c0_i32 = arith.constant 0 : i32
    %c0_i32_0 = arith.constant 0 : i32
    return %arg1, %c0_i32 : i32, i32
  }
  func.func @transform_2(%arg0: i32, %arg1: i32) -> (i32, i32) {
    %c0_i32 = arith.constant 0 : i32
    %c0_i32_0 = arith.constant 0 : i32
    return %arg0, %c0_i32 : i32, i32
  }
}

</mosaic_0001>

<bundles_post_ra>
// kernel: fn.1
= control target key start
LH: loop header
LB: loop body
LE: loop exit
PB: predicated region body
PF: predicated region fallthrough
CT: control target
= control target key end

     0   :  { %vm16_vm0 = vcmask 7168   ;;  %v139_v0 = vmov 0.0   ;;  %vm140_vm1 = vmmov 0   ;;  %v84_v3 = vlaneseq  ;;  %s174_s1 = inlined_call_operand.vmem [shape: bf16[8,128], index: 1, kind: input, shape index: {}]   ;;  %s175_s0 = inlined_call_operand.vmem [shape: bf16[8,128], index: 0, kind: input, shape index: {}]   ;;  %s176_s2 = inlined_call_operand.vmem [shape: f32[8,1], index: 2, kind: output, shape index: {}]  }
   0x1   :  { %17 = vst.msk [vmem:[#allocation2] sm:$0xff] %vm16_vm0, %v139_v0  ;;  %18 = vst.msk [vmem:[#allocation3] sm:$0xff] %vm16_vm0, %v139_v0  ;;  %127 = vmatprep.subr.bf16.mxu0 %v139_v0  ;;  %v20_v1 = vld [vmem:[%s174_s1] sm:$0xf]  ;;  %129 = vmatprep.mubr.msk.bf16.mxu0 %vm140_vm1, %v139_v0  ;;  %vm65_vm3 = vcmask 64512  }
   0x2   :  { %128 = vmatpush3.bf16.xpose.msra.mxu0 %v20_v1  ;;  %v19_v2 = vld [vmem:[%s175_s0] sm:$0xf]  ;;  %v85_v4 = vshrl.u32 %v84_v3, 7  ;;  %v89_v5 = vand.u32 127, %v84_v3 }
   0x4   :  { %v101_v6 = vxor.u32 1, %v85_v4  ;;  %vm93_vm4 = vcmp.eq.s32.totalorder %v89_v5, %v85_v4 }
   0x6   :  { %vm102_vm2 = vcmp.eq.s32.totalorder %v89_v5, %v101_v6 }
   0x8   :  { %v100_v19 = vld [vmem:[#allocation3] sm:$0xff]  ;;  %v64_v22 = vld [vmem:[#allocation2] sm:$0xff] }
   0x9   :  { %130 = vmatmul.mubr.bf16.vlgmr.msra.gmra.mrb[0].mxu0 %v19_v2 }
  0xdc   :  { %v55_v7 = vpop.f32.mrb[0].mxu0 }
  0xdd   :  { %v124_v8 = vadd.f32 -2.0, %v55_v7  ;;  %v131_v9 = vpop.f32.mrb[1].mxu0  ;;  %v103_v10 = vsel %vm102_vm2, %v55_v7, 0.0 }
  0xde   :  { %v58_v11 = vpop.f32.mrb[2].mxu0  ;;  %v104_v12 = vsel %vm65_vm3, %v103_v10, 0.0 }
  0xdf   :  { %v62_v13 = vmul.f32 1.442695, %v124_v8  ;;  %105 = vadd.xlane.f32.xlu1 %v104_v12  ;;  %v132_v14 = vpop.f32.mrb[3].mxu0 }
  0xe1   :  { %135 = vpow2.f32 %v62_v13 }
  0xeb   :  { %v136_v15 = vpop.eup %135 }
  0xec   :  { %v66_v16 = vsel %vm65_vm3, %v136_v15, 0.0  ;;  %v94_v17 = vsel %vm93_vm4, %v136_v15, 0.0 }
  0xed   :  { %67 = vadd.xlane.f32.xlu0 %v66_v16  ;;  %v95_v18 = vsel %vm65_vm3, %v94_v17, 0.0 }
  0xf1   :  { %96 = vadd.xlane.f32.xlu0 %v95_v18 }
 0x16c   :  { %v106_v20 = vpop.xlane.xlu1 %105 }
 0x16d   :  { %v107_v21 = vadd.f32 %v106_v20, %v100_v19 }
 0x16f   :  { %108 = vst.msk [vmem:[#allocation3] sm:$0xff] %vm16_vm0, %v107_v21 }
 0x176   :  { %v117_v33 = vld [vmem:[#allocation3] sm:$0xff] }
 0x17a   :  { %v68_v23 = vpop.xlane.xlu0 %67 }
 0x17b   :  { %v69_v24 = vadd.f32 %v68_v23, %v64_v22 }
 0x17d   :  { %71 = vst.msk [vmem:[#allocation2] sm:$0xff] %vm16_vm0, %v69_v24 }
 0x17e   :  { %v97_v26 = vpop.xlane.xlu0 %96 }
 0x184   :  { %v92_v25 = vld [vmem:[#allocation2] sm:$0xff] }
 0x185   :  { %v98_v27 = vsub.f32 %v92_v25, %v97_v26 }
 0x187   :  { %99 = vst.msk [vmem:[#allocation2] sm:$0xff] %vm16_vm0, %v98_v27 }
 0x18e   :  { %v112_v28 = vld [vmem:[#allocation2] sm:$0xff] }
 0x18f   :  { %v113_v29 = vmax.f32 %v112_v28, 1e-30 }
 0x191   :  { %137 = vlog2.f32 %v113_v29 }
 0x19b   :  { %v138_v30 = vpop.eup %137 }
 0x19c   :  { %v115_v31 = vmul.f32 0.6931472, %v138_v30 }
 0x19e   :  { %v116_v32 = vadd.f32 2.0, %v115_v31 }
 0x1a0   :  { %v118_v34 = vsub.f32 %v116_v32, %v117_v33 }
 0x1a2   :  { %119 = vst.msk [vmem:[%s176_s2] sm:$0xff] %vm16_vm0, %v118_v34 }

</bundles_post_ra>
